<compile_context>
chip_gen: v6e
topology: v6e:2x2x1
jax: 0.10.0
libtpu: 0.0.40
codegen_flags: <defaults>
</compile_context>

<pallas_src>
import functools

import jax
import jax.numpy as jnp
from jax.experimental import pallas as pl
from jax.experimental.pallas import tpu as pltpu


def _xyxy_transform_matrix(out_w):
    """(out_w, out_w) constant matrix: bbox lanes cxcywh->xyxy, class lanes identity.

    Top-left 4x4 block:
        [[ 1,   0,   1,   0 ],
         [ 0,   1,   0,   1 ],
         [-.5,  0,  .5,   0 ],
         [ 0, -.5,   0,  .5 ]]
    Built from iotas + selects so no dense vector constants are needed.
    """
    i = jax.lax.broadcasted_iota(jnp.int32, (out_w, out_w), 0)
    j = jax.lax.broadcasted_iota(jnp.int32, (out_w, out_w), 1)
    diff = j - i
    in_bbox = (i < 4) & (j < 4)
    nz = in_bbox & ((diff == 0) | (diff == 2) | (diff == -2))
    val = jnp.where(i < 2, 1.0, jnp.where(diff < 0, -0.5, 0.5)).astype(jnp.float32)
    m = jnp.where(nz, val, 0.0).astype(jnp.float32)
    # identity pass-through for class-logit lanes (only present when out_w == 8)
    m = m + jnp.where((i >= 4) & (i == j), 1.0, 0.0).astype(jnp.float32)
    return m


def _bbox_head_kernel(x_ref, w1_ref, w2_ref, wout_ref, b_ref, out_ref, *, out_w):
    # x: (B, S, D) -> temporal mean -> (B, D)
    feats = jnp.mean(x_ref[...], axis=1)

    # 3-layer MLP (ReLU on layers 1-2)
    h = jnp.dot(feats, w1_ref[...], preferred_element_type=jnp.float32) + b_ref[0:1, :]
    h = jnp.maximum(h, 0.0)
    h = jnp.dot(h, w2_ref[...], preferred_element_type=jnp.float32) + b_ref[1:2, :]
    h = jnp.maximum(h, 0.0)

    wout = wout_ref[...]                 # (D, out_w): [w3] or [w3 | wc]
    b_out = b_ref[2:3, 0:out_w]          # (1, out_w): [b3] or [b3 | bc]

    # bbox logits live in lanes 0..3 of p
    p = jnp.dot(h, wout, preferred_element_type=jnp.float32) + b_out

    if out_w > 4:
        # class head reads the PRE-MLP features (matches the torch module).
        # Reuse the fused weight and pick per lane: lanes 0..3 <- sigmoid(bbox
        # logits from h), lanes 4..7 <- class logits from feats.  The extra
        # tiny matmul is cheaper/safer than lane-slicing the weight ref.
        c = jnp.dot(feats, wout, preferred_element_type=jnp.float32) + b_out
        lane = jax.lax.broadcasted_iota(jnp.int32, p.shape, 1)
        q = jnp.where(lane < 4, jax.nn.sigmoid(p), c)
    else:
        q = jax.nn.sigmoid(p)

    # cxcywh -> xyxy (and class pass-through) as one small constant matmul.
    m = _xyxy_transform_matrix(out_w)
    out_ref[...] = jnp.dot(q, m, preferred_element_type=jnp.float32).astype(out_ref.dtype)


@functools.partial(jax.jit, static_argnames=("pred_class",))
def bbox_pred_head_forward(vid_feats, params, pred_class=False):
    """vid_feats: (B, S, D) float32. params: dict of (in,out) weights + (1,out) biases."""
    B, S, D = vid_feats.shape
    out_w = 8 if pred_class else 4
    assert D >= out_w, "img_feature_dim must be >= 8"

    # Pack parameters on the wrapper side (cheap XLA concats, outside the kernel)
    if pred_class:
        wout = jnp.concatenate([params["w3"], params["wc"]], axis=1)   # (D, 8)
        b_last = jnp.concatenate([params["b3"], params["bc"]], axis=1)  # (1, 8)
    else:
        wout = params["w3"]                                             # (D, 4)
        b_last = params["b3"]                                           # (1, 4)
    b_last = jnp.pad(b_last, ((0, 0), (0, D - out_w)))                  # (1, D)
    b_pack = jnp.concatenate([params["b1"], params["b2"], b_last], axis=0)  # (3, D)

    out = pl.pallas_call(
        functools.partial(_bbox_head_kernel, out_w=out_w),
        out_shape=jax.ShapeDtypeStruct((B, out_w), jnp.float32),
        # whole-array blocks in VMEM (no grid): shapes are tiny
        in_specs=[pl.BlockSpec(memory_space=pltpu.MemorySpace.VMEM)] * 5,
        out_specs=pl.BlockSpec(memory_space=pltpu.MemorySpace.VMEM),
    )(vid_feats, params["w1"], params["w2"], wout, b_pack)

    bbox = out[:, :4]
    if pred_class:
        return bbox, out[:, 4:]
    return bbox, None


def init_params(key, img_feature_dim):
    D = img_feature_dim
    ks = jax.random.split(key, 8)
    scale = 0.05
    params = {
        # MLP layer 1: D -> D
        "w1": scale * jax.random.normal(ks[0], (D, D), jnp.float32),
        "b1": scale * jax.random.normal(ks[1], (1, D), jnp.float32),
        # MLP layer 2: D -> D
        "w2": scale * jax.random.normal(ks[2], (D, D), jnp.float32),
        "b2": scale * jax.random.normal(ks[3], (1, D), jnp.float32),
        # MLP layer 3: D -> 4
        "w3": scale * jax.random.normal(ks[4], (D, 4), jnp.float32),
        "b3": scale * jax.random.normal(ks[5], (1, 4), jnp.float32),
        # class head: D -> 4
        "wc": scale * jax.random.normal(ks[6], (D, 4), jnp.float32),
        "bc": scale * jax.random.normal(ks[7], (1, 4), jnp.float32),
    }
    return params


def _reference(vid_feats, params, pred_class):
    feats = jnp.mean(vid_feats, axis=1)
    h = jax.nn.relu(feats @ params["w1"] + params["b1"])
    h = jax.nn.relu(h @ params["w2"] + params["b2"])
    p = jax.nn.sigmoid(h @ params["w3"] + params["b3"])
    cx, cy, w, hh = p[:, 0], p[:, 1], p[:, 2], p[:, 3]
    bbox = jnp.stack([cx - 0.5 * w, cy - 0.5 * hh, cx + 0.5 * w, cy + 0.5 * hh], axis=-1)
    cls = feats @ params["wc"] + params["bc"] if pred_class else None
    return bbox, cls


if __name__ == "__main__":
    key = jax.random.PRNGKey(0)
    k_in, k_par = jax.random.split(key)

    B, S, D = 2, 8, 32  # batch, frames, img_feature_dim
    vid_feats = jax.random.normal(k_in, (B, S, D), jnp.float32)
    params = init_params(k_par, D)

    ok = True
    # exercise both static kernel variants (default pred_class=False, plus True)
    for pred_class in (False, True):
        bbox_pred, class_pred = bbox_pred_head_forward(vid_feats, params, pred_class=pred_class)
        bbox_pred = jax.block_until_ready(bbox_pred)
        if class_pred is not None:
            class_pred = jax.block_until_ready(class_pred)

        ref_bbox, ref_cls = _reference(vid_feats, params, pred_class)
        ok &= bool(jnp.allclose(bbox_pred, ref_bbox, atol=1e-5, rtol=1e-5))
        if pred_class:
            ok &= bool(jnp.allclose(class_pred, ref_cls, atol=1e-5, rtol=1e-5))

    assert ok, "Pallas kernel does not match pure-JAX reference"
    print("KERNEL_OK")
</pallas_src>

<mosaic_0001>
module attributes {stable_mosaic.version = 11 : i64} {
  func.func @_bbox_head_kernel(%arg0: memref<2x8x32xf32, #tpu.memory_space<vmem>>, %arg1: memref<32x32xf32, #tpu.memory_space<vmem>>, %arg2: memref<32x32xf32, #tpu.memory_space<vmem>>, %arg3: memref<32x4xf32, #tpu.memory_space<vmem>>, %arg4: memref<3x32xf32, #tpu.memory_space<vmem>>, %arg5: memref<2x4xf32, #tpu.memory_space<vmem>>) attributes {dimension_semantics = [], scalar_prefetch = 0 : i64, scratch_operands = 0 : i64, tpu.core_type = #tpu.core_type<tc>} {
    %c0 = arith.constant 0 : index
    %c0_0 = arith.constant 0 : index
    %c0_1 = arith.constant 0 : index
    %0 = vector.load %arg0[%c0, %c0_0, %c0_1] : memref<2x8x32xf32, #tpu.memory_space<vmem>>, vector<2x8x32xf32>
    %cst = arith.constant dense<0.000000e+00> : vector<2x32xf32>
    %1 = vector.multi_reduction <add>, %0, %cst [1] : vector<2x8x32xf32> to vector<2x32xf32>
    %cst_2 = arith.constant 8.000000e+00 : f32
    %2 = vector.broadcast %cst_2 : f32 to vector<2x32xf32>
    %3 = arith.divf %1, %2 : vector<2x32xf32>
    %c0_3 = arith.constant 0 : index
    %c0_4 = arith.constant 0 : index
    %4 = vector.load %arg1[%c0_3, %c0_4] : memref<32x32xf32, #tpu.memory_space<vmem>>, vector<32x32xf32>
    %cst_5 = arith.constant dense<0.000000e+00> : vector<2x32xf32>
    %5 = tpu.matmul %3, %4, %cst_5 {dimension_numbers = #tpu.dot_dimension_numbers<[1], [0], [0], [1], [0, 0, 1, 1], [], []>} : vector<2x32xf32>, vector<32x32xf32>, vector<2x32xf32> -> vector<2x32xf32>
    %c0_6 = arith.constant 0 : index
    %c0_7 = arith.constant 0 : index
    %6 = vector.load %arg4[%c0_6, %c0_7] : memref<3x32xf32, #tpu.memory_space<vmem>>, vector<1x32xf32>
    %7 = vector.broadcast %6 : vector<1x32xf32> to vector<2x32xf32>
    %8 = arith.addf %5, %7 : vector<2x32xf32>
    %cst_8 = arith.constant 0.000000e+00 : f32
    %9 = vector.broadcast %cst_8 : f32 to vector<2x32xf32>
    %10 = arith.maximumf %8, %9 : vector<2x32xf32>
    %c0_9 = arith.constant 0 : index
    %c0_10 = arith.constant 0 : index
    %11 = vector.load %arg2[%c0_9, %c0_10] : memref<32x32xf32, #tpu.memory_space<vmem>>, vector<32x32xf32>
    %cst_11 = arith.constant dense<0.000000e+00> : vector<2x32xf32>
    %12 = tpu.matmul %10, %11, %cst_11 {dimension_numbers = #tpu.dot_dimension_numbers<[1], [0], [0], [1], [0, 0, 1, 1], [], []>} : vector<2x32xf32>, vector<32x32xf32>, vector<2x32xf32> -> vector<2x32xf32>
    %c1 = arith.constant 1 : index
    %c0_12 = arith.constant 0 : index
    %13 = vector.load %arg4[%c1, %c0_12] : memref<3x32xf32, #tpu.memory_space<vmem>>, vector<1x32xf32>
    %14 = vector.broadcast %13 : vector<1x32xf32> to vector<2x32xf32>
    %15 = arith.addf %12, %14 : vector<2x32xf32>
    %cst_13 = arith.constant 0.000000e+00 : f32
    %16 = vector.broadcast %cst_13 : f32 to vector<2x32xf32>
    %17 = arith.maximumf %15, %16 : vector<2x32xf32>
    %c0_14 = arith.constant 0 : index
    %c0_15 = arith.constant 0 : index
    %18 = vector.load %arg3[%c0_14, %c0_15] : memref<32x4xf32, #tpu.memory_space<vmem>>, vector<32x4xf32>
    %c2 = arith.constant 2 : index
    %c0_16 = arith.constant 0 : index
    %19 = vector.load %arg4[%c2, %c0_16] : memref<3x32xf32, #tpu.memory_space<vmem>>, vector<1x4xf32>
    %cst_17 = arith.constant dense<0.000000e+00> : vector<2x4xf32>
    %20 = tpu.matmul %17, %18, %cst_17 {dimension_numbers = #tpu.dot_dimension_numbers<[1], [0], [0], [1], [0, 0, 1, 1], [], []>} : vector<2x32xf32>, vector<32x4xf32>, vector<2x4xf32> -> vector<2x4xf32>
    %21 = vector.broadcast %19 : vector<1x4xf32> to vector<2x4xf32>
    %22 = arith.addf %20, %21 : vector<2x4xf32>
    %23 = arith.negf %22 : vector<2x4xf32>
    %24 = math.exp %23 : vector<2x4xf32>
    %cst_18 = arith.constant 1.000000e+00 : f32
    %25 = vector.broadcast %cst_18 : f32 to vector<2x4xf32>
    %26 = arith.addf %25, %24 : vector<2x4xf32>
    %27 = arith.divf %25, %26 : vector<2x4xf32>
    %28 = tpu.iota {dimensions = array<i32: 0>} : vector<4x4xi32>
    %29 = tpu.iota {dimensions = array<i32: 1>} : vector<4x4xi32>
    %30 = arith.subi %29, %28 : vector<4x4xi32>
    %c4_i32 = arith.constant 4 : i32
    %31 = vector.broadcast %c4_i32 : i32 to vector<4x4xi32>
    %32 = arith.cmpi slt, %28, %31 : vector<4x4xi32>
    %c4_i32_19 = arith.constant 4 : i32
    %33 = vector.broadcast %c4_i32_19 : i32 to vector<4x4xi32>
    %34 = arith.cmpi slt, %29, %33 : vector<4x4xi32>
    %35 = arith.andi %32, %34 : vector<4x4xi1>
    %c0_i32 = arith.constant 0 : i32
    %36 = vector.broadcast %c0_i32 : i32 to vector<4x4xi32>
    %37 = arith.cmpi eq, %30, %36 : vector<4x4xi32>
    %c2_i32 = arith.constant 2 : i32
    %38 = vector.broadcast %c2_i32 : i32 to vector<4x4xi32>
    %39 = arith.cmpi eq, %30, %38 : vector<4x4xi32>
    %40 = arith.ori %37, %39 : vector<4x4xi1>
    %c-2_i32 = arith.constant -2 : i32
    %41 = vector.broadcast %c-2_i32 : i32 to vector<4x4xi32>
    %42 = arith.cmpi eq, %30, %41 : vector<4x4xi32>
    %43 = arith.ori %40, %42 : vector<4x4xi1>
    %44 = arith.andi %35, %43 : vector<4x4xi1>
    %c2_i32_20 = arith.constant 2 : i32
    %45 = vector.broadcast %c2_i32_20 : i32 to vector<4x4xi32>
    %46 = arith.cmpi slt, %28, %45 : vector<4x4xi32>
    %c0_i32_21 = arith.constant 0 : i32
    %47 = vector.broadcast %c0_i32_21 : i32 to vector<4x4xi32>
    %48 = arith.cmpi slt, %30, %47 : vector<4x4xi32>
    %cst_22 = arith.constant -5.000000e-01 : f32
    %cst_23 = arith.constant 5.000000e-01 : f32
    %49 = vector.broadcast %cst_22 : f32 to vector<4x4xf32>
    %50 = vector.broadcast %cst_23 : f32 to vector<4x4xf32>
    %51 = arith.select %48, %49, %50 : vector<4x4xi1>, vector<4x4xf32>
    %cst_24 = arith.constant 1.000000e+00 : f32
    %52 = vector.broadcast %cst_24 : f32 to vector<4x4xf32>
    %53 = arith.select %46, %52, %51 : vector<4x4xi1>, vector<4x4xf32>
    %cst_25 = arith.constant 0.000000e+00 : f32
    %54 = vector.broadcast %cst_25 : f32 to vector<4x4xf32>
    %55 = arith.select %44, %53, %54 : vector<4x4xi1>, vector<4x4xf32>
    %c4_i32_26 = arith.constant 4 : i32
    %56 = vector.broadcast %c4_i32_26 : i32 to vector<4x4xi32>
    %57 = arith.cmpi sge, %28, %56 : vector<4x4xi32>
    %58 = arith.cmpi eq, %28, %29 : vector<4x4xi32>
    %59 = arith.andi %57, %58 : vector<4x4xi1>
    %cst_27 = arith.constant 1.000000e+00 : f32
    %cst_28 = arith.constant 0.000000e+00 : f32
    %60 = vector.broadcast %cst_27 : f32 to vector<4x4xf32>
    %61 = vector.broadcast %cst_28 : f32 to vector<4x4xf32>
    %62 = arith.select %59, %60, %61 : vector<4x4xi1>, vector<4x4xf32>
    %63 = arith.addf %55, %62 : vector<4x4xf32>
    %cst_29 = arith.constant dense<0.000000e+00> : vector<2x4xf32>
    %64 = tpu.matmul %27, %63, %cst_29 {dimension_numbers = #tpu.dot_dimension_numbers<[1], [0], [0], [1], [0, 0, 1, 1], [], []>} : vector<2x4xf32>, vector<4x4xf32>, vector<2x4xf32> -> vector<2x4xf32>
    %c0_30 = arith.constant 0 : index
    %c0_31 = arith.constant 0 : index
    %65 = vector.load %arg5[%c0_30, %c0_31] : memref<2x4xf32, #tpu.memory_space<vmem>>, vector<2x4xf32>
    tpu.vector_store %arg5[%c0_30, %c0_31], %64 {strides = array<i32>} : memref<2x4xf32, #tpu.memory_space<vmem>>, vector<2x4xf32>,
    return
  }
}

</mosaic_0001>

<bundles_post_ra>
// kernel: bbox_pred_head_forward.1
= control target key start
LH: loop header
LB: loop body
LE: loop exit
PB: predicated region body
PF: predicated region fallthrough
CT: control target
= control target key end

     0   :  { %10 = vsyncpa [#allocation3], 0  ;;  %s665_s0 = inlined_call_operand.vmem [shape: f32[2,8,32], index: 0, kind: input, shape index: {}]   ;;  %s666_s1 = inlined_call_operand.vmem [shape: f32[32,32], index: 1, kind: input, shape index: {}]   ;;  %s667_s2 = inlined_call_operand.hbm [shape: f32[32,32], index: 2, kind: input, shape index: {}]   ;;  %s668_s3 = inlined_call_operand.vmem [shape: f32[32,4], index: 3, kind: input, shape index: {}]   ;;  %s669_s4 = inlined_call_operand.vmem [shape: f32[3,32], index: 4, kind: input, shape index: {}]   ;;  %s670_s5 = inlined_call_operand.hbm [shape: f32[2,4], index: 5, kind: output, shape index: {}]  }
   0x1   :  { %11 = vsyncpa [#allocation4], 0  ;;  %s550_s18 = smov [#allocation2]  }
   0x2   :  { %s21_s19 = sshll.u32 %s550_s18, 4  ;;  %s22_s19 = int_to_ptr.vmem [resolvable:$true] %s21_s19 }
   0x3   :  { %s514_s20 = scalar_lea.vmem %s22_s19, 512  ;;  %p519_p1 = scmp.lt.s32.totalorder %s22_s19, %s22_s19 }
   0x4   :  { %p515_p0 = scmp.ne.s32.totalorder %s22_s19, %s514_s20  ;;  %p520_p2 = scmp.lt.s32.totalorder %s514_s20, %s514_s20 }
   0x6   :  { %p521_p3 = por %p520_p2, %p519_p1 }
   0x8   :  { %p522_p4 = pnand %p521_p3, %p515_p0 }
   0xa   :  { %525 = shalt.err (!%p522_p4)
}
   0xb   :  { %s551_s21 = smov 128   ;;  %s552_s22 = smov 8  }
   0xc   :  { %27 = dma.hbm_to_vmem [thread:$0]  %s667_s2, 512, %s22_s19, [#allocation3], %s551_s21, %s551_s21, %s552_s22  }
   0xd   :  { %546 = dma.done.wait [#allocation3], 512  }
   0xe   :  { %547 = vsyncadd [#allocation3], 4294966784  ;;  %v553_v0 = vmov 0.0   ;;  %vm554_vm0 = vmmov 0   ;;  %vm37_vm1 = vcmask 261120   ;;  %v58_v1 = vld [vmem:[%s666_s1 + $0x18] sm:$0xff]  ;;  %v312_v42 = vlaneseq }
   0xf   :  { %457 = vmatprep.subr.mxu0 %v553_v0  ;;  %465 = vmatprep.mubr.msk.f32.mxu0 %vm554_vm0, %v553_v0  ;;  %v57_v2 = vld [vmem:[%s666_s1 + $0x10] sm:$0xff]  ;;  %v35_v3 = vld [vmem:[%s665_s0] sm:$0xff]  ;;  %v36_v4 = vld [vmem:[%s665_s0 + $0x8] sm:$0xff]  ;;  %vm66_vm2 = vcmask 1041409   ;;  %v555_v47 = vmov 0.5   ;;  %s556_s22 = smov [#allocation5]  }
  0x10   :  { %468 = vmatprep.subr.mxu1 %v553_v0  ;;  %476 = vmatprep.mubr.msk.f32.mxu1 %vm554_vm0, %v553_v0  ;;  %v56_v5 = vld [vmem:[%s666_s1 + $0x8] sm:$0xff]  ;;  %v38_v6 = vsel %vm37_vm1, %v35_v3, 0.0  ;;  %v45_v7 = vsel %vm37_vm1, %v36_v4, 0.0  ;;  %v144_v8 = vld [vmem:[#allocation2 + $0x18] sm:$0xff]  ;;  %v55_v11 = vld [vmem:[%s666_s1] sm:$0xff]  ;;  %v313_v43 = vshrl.u32 %v312_v42, 7 }
  0x11   :  { %458 = vmatpush3.msra.mxu0 %v58_v1  ;;  %v39_v9 = vrot.slane %v38_v6, 4  ;;  %v46_v10 = vrot.slane %v45_v7, 4  ;;  %469 = vmatpush3.msra.mxu1 %v144_v8  ;;  %v143_v25 = vld [vmem:[#allocation2 + $0x10] sm:$0xff]  ;;  %v142_v26 = vld [vmem:[#allocation2 + $0x8] sm:$0xff]  ;;  %v141_v27 = vld [vmem:[#allocation2] sm:$0xff]  ;;  %v315_v44 = vand.u32 127, %v312_v42 }
  0x12   :  { %459 = vmatprep.subr.mxu0 %v553_v0  ;;  %470 = vmatprep.subr.mxu1 %v553_v0  ;;  %v227_v28 = vld [vmem:[%s668_s3 + $0x18] sm:$0xff]  ;;  %v431_v29 = vld [vmem:[%s669_s4] ss:$0 sm:$0xff]  ;;  %v226_v34 = vld [vmem:[%s668_s3 + $0x10] sm:$0xff]  ;;  %vm317_vm3 = vcmp.lt.s32.totalorder %v313_v43, 4  ;;  %vm326_vm6 = vcmp.lt.s32.totalorder %v313_v43, 2 }
  0x13   :  { %460 = vmatpush3.msra.mxu0 %v57_v2  ;;  %v40_v12 = vadd.f32 %v39_v9, %v38_v6  ;;  %v47_v13 = vadd.f32 %v46_v10, %v45_v7  ;;  %471 = vmatpush3.msra.mxu1 %v143_v25  ;;  %v225_v35 = vld [vmem:[%s668_s3 + $0x8] sm:$0xff]  ;;  %v224_v36 = vld [vmem:[%s668_s3] sm:$0xff]  ;;  %v316_v45 = vsub.s32 %v315_v44, %v313_v43  ;;  %vm318_vm4 = vcmp.lt.s32.totalorder %v315_v44, 4  ;;  %s422_s23 = sshll.u32 %s556_s22, 4  ;;  %s423_s23 = int_to_ptr.vmem [resolvable:$true] %s422_s23 }
  0x14   :  { %461 = vmatprep.subr.mxu0 %v553_v0  ;;  %472 = vmatprep.subr.mxu1 %v553_v0  ;;  %v433_v37 = vld [vmem:[%s669_s4 + $0x1] ss:$0 sm:$0xff]  ;;  %vm652_vm5 = vmand %vm317_vm3, %vm318_vm4  ;;  %vm331_vm7 = vcmp.ge.s32.totalorder %v313_v43, 4  ;;  %vm332_vm8 = vcmp.eq.s32.totalorder %v313_v43, %v315_v44  ;;  %v435_v53 = vld [vmem:[%s669_s4 + $0x2] ss:$0 sm:$0xff]  ;;  %vm414_vm3 = vcmask 25600   ;;  %p531_p6 = scmp.lt.s32.totalorder %s423_s23, %s423_s23 }
  0x15   :  { %462 = vmatpush3.msra.mxu0 %v56_v5  ;;  %v41_v14 = vrot.slane %v40_v12, 2  ;;  %v48_v15 = vrot.slane %v47_v13, 2  ;;  %473 = vmatpush3.msra.mxu1 %v142_v26  ;;  %vm320_vm9 = vcmp.eq.s32.totalorder %v316_v45, 0  ;;  %vm321_vm10 = vcmp.eq.s32.totalorder %v316_v45, 2  ;;  %vm333_vm13 = vmand %vm331_vm7, %vm332_vm8  ;;  %s526_s24 = scalar_lea.vmem %s423_s23, 32 }
  0x16   :  { %463 = vmatprep.subr.mxu0 %v553_v0  ;;  %474 = vmatprep.subr.mxu1 %v553_v0  ;;  %vm323_vm11 = vcmp.eq.s32.totalorder %v316_v45, 4294967294  ;;  %vm327_vm12 = vcmp.lt.s32.totalorder %v316_v45, 0  ;;  %vm322_vm14 = vmor %vm320_vm9, %vm321_vm10  ;;  %v334_v50 = vsel %vm333_vm13, 1.0, %v553_v0  ;;  %p527_p5 = scmp.ne.s32.totalorder %s423_s23, %s526_s24  ;;  %p532_p7 = scmp.lt.s32.totalorder %s526_s24, %s526_s24 }
  0x17   :  { %464 = vmatpush3.msra.mxu0 %v55_v11  ;;  %v42_v16 = vadd.f32 %v41_v14, %v40_v12  ;;  %v49_v17 = vadd.f32 %v48_v15, %v47_v13  ;;  %475 = vmatpush3.msra.mxu1 %v141_v27  ;;  %v328_v48 = vsel %vm327_vm12, -0.5, %v555_v47  ;;  %vm324_vm15 = vmor %vm322_vm14, %vm323_vm11 }
  0x18   :  { %479 = vmatprep.subr.mxu0 %v553_v0  ;;  %490 = vmatprep.subr.mxu1 %v553_v0  ;;  %v329_v49 = vsel %vm326_vm6, 1.0, %v328_v48  ;;  %p533_p8 = por %p532_p7, %p531_p6 }
  0x19   :  { %v43_v18 = vrot.slane %v42_v16, 1  ;;  %v50_v19 = vrot.slane %v49_v17, 1 }
  0x1a   :  { %p534_p9 = pnand %p533_p8, %p527_p5 }
  0x1b   :  { %v44_v20 = vadd.f32 %v43_v18, %v42_v16  ;;  %v51_v21 = vadd.f32 %v50_v19, %v49_v17 }
  0x1d   :  { %v53_v22 = vmul.f32 0.125, %v44_v20  ;;  %v54_v23 = vmul.f32 0.125, %v51_v21 }
  0x1f   :  { %v67_v24 = vsel %vm66_vm2, %v54_v23, %v53_v22  ;;  %vm336_vm2 = vcmask 31744  }
  0x20   :  { %466 = vmatmul.mubr.msk.f32.vlgmr.msra.gmra.mxu0 %vm37_vm1, %v67_v24 }
  0x21   :  { %487 = vmatprep.mubr.msk.f32.mxu0 %vm554_vm0, %v553_v0  ;;  %480 = vmatpush3.msra.mxu0 %v227_v28 }
  0x22   :  { %481 = vmatprep.subr.mxu0 %v553_v0 }
  0x23   :  { %482 = vmatpush3.msra.mxu0 %v226_v34 }
  0x24   :  { %483 = vmatprep.subr.mxu0 %v553_v0 }
  0x25   :  { %484 = vmatpush3.msra.mxu0 %v225_v35 }
  0x26   :  { %485 = vmatprep.subr.mxu0 %v553_v0 }
  0x27   :  { %486 = vmatpush3.msra.mxu0 %v224_v36 }
  0xe0   :  { %v136_v30 = vpop.f32.mrf.mxu0 }
  0xe1   :  { %v137_v31 = vadd.f32 %v431_v29, %v136_v30 }
  0xe2   :  { %v467_v32 = vpop.f32.mrf.mxu0 }
  0xe3   :  { %v140_v33 = vmax.f32 %v137_v31, 0.0 }
  0xe5   :  { %477 = vmatmul.mubr.msk.f32.vlgmr.msra.gmra.mxu1 %vm37_vm1, %v140_v33 }
  0xe6   :  { %492 = vmatprep.mubr.msk.f32.mxu1 %vm554_vm0, %v553_v0  ;;  %vm325_vm0 = vmand %vm652_vm5, %vm324_vm15 }
  0xe7   :  { %v330_v51 = vsel %vm325_vm0, %v329_v49, 0.0 }
  0xe8   :  { %v335_v52 = vadd.f32 %v334_v50, %v330_v51 }
 0x1a5   :  { %v219_v38 = vpop.f32.mrf.mxu1 }
 0x1a6   :  { %v220_v39 = vadd.f32 %v433_v37, %v219_v38 }
 0x1a7   :  { %v478_v40 = vpop.f32.mrf.mxu1 }
 0x1a8   :  { %v223_v41 = vmax.f32 %v220_v39, 0.0 }
 0x1aa   :  { %488 = vmatmul.mubr.msk.f32.vlgmr.msra.gmra.mxu0 %vm37_vm1, %v223_v41  ;;  %vm340_vm1 = vcmask 1043456  }
 0x1ab   :  { %491 = vmatpush3.msk.msra.mxu1 %vm340_vm1, %v335_v52 }
 0x26a   :  { %v302_v54 = vpop.f32.mrf.mxu0 }
 0x26b   :  { %v303_v55 = vadd.f32 %v435_v53, %v302_v54 }
 0x26c   :  { %v489_v56 = vpop.f32.mrf.mxu0 }
 0x26d   :  { %v437_v57 = vmul.f32 -1.442695, %v303_v55 }
 0x26f   :  { %502 = vpow2.f32 %v437_v57 }
 0x27c   :  { %v503_v58 = vpop.eup %502 }
 0x27d   :  { %v309_v59 = vadd.f32 1.0, %v503_v58 }
 0x27f   :  { %504 = vrcp.f32 %v309_v59 }
 0x28c   :  { %v505_v60 = vpop.eup %504 }
 0x28d   :  { %493 = vmatmul.mubr.msk.f32.vlgmr.msra.gmra.mxu1 %vm336_vm2, %v505_v60 }
 0x34d   :  { %v410_v61 = vpop.f32.mrf.mxu1 }
 0x34e   :  { %415 = vst.msk [vmem:[#allocation5] sm:$0x3] %vm414_vm3, %v410_v61 }
 0x34f   :  { %v494_v62 = vpop.f32.mrf.mxu1 }
 0x350   :  { %537 = shalt.err (!%p534_p9)
}
 0x351   :  { %425 = dma.vmem_to_hbm [thread:$0]  %s423_s23, 32, %s670_s5, [#allocation4]  }
 0x352   :  { %548 = dma.done.wait [#allocation4], 32  }
 0x353   :  { %549 = vsyncadd [#allocation4], 4294967264 }
 0x354   :  { %429 = vsyncpa [#allocation3], 1 }
 0x355   :  { %430 = vsyncpa [#allocation4], 1 }

</bundles_post_ra>
